<compile_context>
chip_gen: v7x
topology: tpu7x:2x2x1
jax: 0.10.0
libtpu: 0.0.40
codegen_flags: <defaults>
</compile_context>

<pallas_src>
import jax
import jax.numpy as jnp
from jax.experimental import pallas as pl
from jax.experimental.pallas import tpu as pltpu


def _make_policy_kernel(action_bound: float, compute_dtype):
    """Kernel with action_bound baked in as a compile-time constant.

    Transposed (batch-on-lanes) layout:
      xt_ref : (S, Tb) f32   -- batch on the lane axis
      w1_ref : (H, S)  bf16  -- torch fc1.weight layout (out_features, in_features)
      b1_ref : (H, 1)  f32
      w2_ref : (A, H)  bf16  -- torch fc2.weight layout
      b2_ref : (A, 1)  f32
      ot_ref : (A, Tb) f32   -- lane-dense output tile
    """

    def kernel(xt_ref, w1_ref, b1_ref, w2_ref, b2_ref, ot_ref):
        # In-kernel cast to the MXU dtype (VPU op, hidden under the matmul);
        # avoids a separate wrapper-side HBM read+write pass over x.
        xt = xt_ref[...].astype(compute_dtype)
        # fc1: (H, S) @ (S, Tb) -> (H, Tb), f32 accumulation on the MXU.
        h = jnp.dot(w1_ref[...], xt, preferred_element_type=jnp.float32)
        h = jnp.maximum(h + b1_ref[...], 0.0)              # bias + relu in f32
        # fc2: (A, H) @ (H, Tb) -> (A, Tb).
        a = jnp.dot(w2_ref[...], h.astype(compute_dtype),
                    preferred_element_type=jnp.float32)
        a = jnp.tanh(a + b2_ref[...]) * action_bound        # tanh/scale in f32 (EUP)
        ot_ref[...] = a.astype(ot_ref.dtype)

    return kernel


def policy_net_forward(x, w1, b1, w2, b2, action_bound, *,
                       block_b: int = 4096,
                       compute_dtype=jnp.bfloat16):
    """DDPG PolicyNet forward: tanh(fc2(relu(fc1(x)))) * action_bound.

    x : (B, S) f32
    w1: (H, S), b1: (H,)   -- torch nn.Linear layout (out_features, in_features)
    w2: (A, H), b2: (A,)
    Returns (B, A) f32.
    """
    B, S = x.shape
    H = w1.shape[0]
    A = w2.shape[0]

    # Layout plumbing (not compute): put the batch on the lane axis.  Weights
    # stay in their native torch (out, in) layout -> no parameter transpose.
    xt = x.T                                    # (S, B) f32; bf16 cast in-kernel
    w1c = w1.astype(compute_dtype)              # (H, S), tiny one-time cast
    w2c = w2.astype(compute_dtype)              # (A, H)
    b1c = b1.reshape(H, 1).astype(jnp.float32)
    b2c = b2.reshape(A, 1).astype(jnp.float32)

    kernel = _make_policy_kernel(float(action_bound), compute_dtype)

    cost = pl.CostEstimate(
        flops=2 * B * (S * H + H * A),
        transcendentals=B * A,                                          # tanh
        bytes_accessed=B * (S * 4 + A * 4) + 2 * (S * H + H * A) + 4 * (H + A),
    )

    if B <= block_b:
        # Small batch: single invocation, no grid / pipeline scaffolding;
        # whole operands placed explicitly in VMEM.
        out_t = pl.pallas_call(
            kernel,
            out_shape=jax.ShapeDtypeStruct((A, B), jnp.float32),
            in_specs=[pl.BlockSpec(memory_space=pltpu.MemorySpace.VMEM)] * 5,
            out_specs=pl.BlockSpec(memory_space=pltpu.MemorySpace.VMEM),
            cost_estimate=cost,
        )(xt, w1c, b1c, w2c, b2c)
        return out_t.T

    # Large batch: 1-D grid over the lane (batch) axis.  No wrapper-side pad or
    # slice: pl.cdiv grid + Pallas boundary clamping handles the ragged tail.
    n_blocks = pl.cdiv(B, block_b)
    out_t = pl.pallas_call(
        kernel,
        out_shape=jax.ShapeDtypeStruct((A, B), jnp.float32),
        grid=(n_blocks,),
        in_specs=[
            pl.BlockSpec((S, block_b), lambda i: (0, i)),   # x^T tile (streams)
            pl.BlockSpec((H, S), lambda i: (0, 0)),         # W1 (VMEM-resident)
            pl.BlockSpec((H, 1), lambda i: (0, 0)),         # b1 (resident)
            pl.BlockSpec((A, H), lambda i: (0, 0)),         # W2 (resident)
            pl.BlockSpec((A, 1), lambda i: (0, 0)),         # b2 (resident)
        ],
        out_specs=pl.BlockSpec((A, block_b), lambda i: (0, i)),  # lane-dense
        compiler_params=pltpu.CompilerParams(
            dimension_semantics=("parallel",)),
        cost_estimate=cost,
    )(xt, w1c, b1c, w2c, b2c)
    return out_t.T


def _torch_linear_init(key, in_dim, out_dim):
    # torch.nn.Linear default init: U(-1/sqrt(in_dim), 1/sqrt(in_dim)),
    # weight stored as (out_features, in_features).
    kw, kb = jax.random.split(key)
    bound = 1.0 / float(in_dim) ** 0.5
    w = jax.random.uniform(kw, (out_dim, in_dim), jnp.float32, -bound, bound)
    b = jax.random.uniform(kb, (out_dim,), jnp.float32, -bound, bound)
    return w, b


def _policy_ref(x, w1, b1, w2, b2, action_bound, compute_dtype):
    # Pure-JAX reference in the natural torch orientation.
    h = jnp.dot(x.astype(compute_dtype), w1.T.astype(compute_dtype),
                preferred_element_type=jnp.float32) + b1
    h = jnp.maximum(h, 0.0)
    a = jnp.dot(h.astype(compute_dtype), w2.T.astype(compute_dtype),
                preferred_element_type=jnp.float32) + b2
    return jnp.tanh(a) * action_bound


if __name__ == "__main__":
    state_dim, hidden_dim, action_dim = 16, 32, 8
    action_bound = 2.0

    key = jax.random.PRNGKey(0)
    k_x, k_xbig, k_fc1, k_fc2 = jax.random.split(key, 4)

    w1, b1 = _torch_linear_init(k_fc1, state_dim, hidden_dim)   # (32,16), (32,)
    w2, b2 = _torch_linear_init(k_fc2, hidden_dim, action_dim)  # (8,32), (8,)

    # --- small batch: no-grid VMEM-resident path ----------------------------
    batch = 8
    x = jax.random.normal(k_x, (batch, state_dim), jnp.float32)
    out = jax.block_until_ready(
        policy_net_forward(x, w1, b1, w2, b2, action_bound))
    assert out.shape == (batch, action_dim)

    ref_bf16 = _policy_ref(x, w1, b1, w2, b2, action_bound, jnp.bfloat16)
    ref_f32 = _policy_ref(x, w1, b1, w2, b2, action_bound, jnp.float32)
    assert jnp.allclose(out, ref_bf16, atol=1e-2, rtol=1e-2)
    assert jnp.allclose(out, ref_f32, atol=8e-2, rtol=8e-2)
    assert bool(jnp.all(jnp.abs(out) <= action_bound + 1e-5))

    # --- large batch: lane-tiled grid path, ragged (non-multiple) batch -----
    big_batch = 1000
    xb = jax.random.normal(k_xbig, (big_batch, state_dim), jnp.float32)
    outb = jax.block_until_ready(
        policy_net_forward(xb, w1, b1, w2, b2, action_bound, block_b=256))
    assert outb.shape == (big_batch, action_dim)

    refb_bf16 = _policy_ref(xb, w1, b1, w2, b2, action_bound, jnp.bfloat16)
    refb_f32 = _policy_ref(xb, w1, b1, w2, b2, action_bound, jnp.float32)
    assert jnp.allclose(outb, refb_bf16, atol=1e-2, rtol=1e-2)
    assert jnp.allclose(outb, refb_f32, atol=8e-2, rtol=8e-2)

    print("KERNEL_OK")
</pallas_src>

<mosaic_0001>
module attributes {stable_mosaic.version = 11 : i64} {
  func.func @kernel(%arg0: memref<16x8xf32, #tpu.memory_space<vmem>>, %arg1: memref<32x16xbf16, #tpu.memory_space<vmem>>, %arg2: memref<32x1xf32, #tpu.memory_space<vmem>>, %arg3: memref<8x32xbf16, #tpu.memory_space<vmem>>, %arg4: memref<8x1xf32, #tpu.memory_space<vmem>>, %arg5: memref<8x8xf32, #tpu.memory_space<vmem>>) attributes {dimension_semantics = [], scalar_prefetch = 0 : i64, scratch_operands = 0 : i64, tpu.core_type = #tpu.core_type<tc>} {
    %c0 = arith.constant 0 : index
    %c0_0 = arith.constant 0 : index
    %0 = vector.load %arg0[%c0, %c0_0] : memref<16x8xf32, #tpu.memory_space<vmem>>, vector<16x8xf32>
    %1 = arith.truncf %0 : vector<16x8xf32> to vector<16x8xbf16>
    %c0_1 = arith.constant 0 : index
    %c0_2 = arith.constant 0 : index
    %2 = vector.load %arg1[%c0_1, %c0_2] : memref<32x16xbf16, #tpu.memory_space<vmem>>, vector<32x16xbf16>
    %cst = arith.constant dense<0.000000e+00> : vector<32x8xf32>
    %3 = tpu.matmul %2, %1, %cst {dimension_numbers = #tpu.dot_dimension_numbers<[1], [0], [0], [1], [0, 0, 1, 1], [], []>} : vector<32x16xbf16>, vector<16x8xbf16>, vector<32x8xf32> -> vector<32x8xf32>
    %c0_3 = arith.constant 0 : index
    %c0_4 = arith.constant 0 : index
    %4 = vector.load %arg2[%c0_3, %c0_4] : memref<32x1xf32, #tpu.memory_space<vmem>>, vector<32x1xf32>
    %5 = vector.broadcast %4 : vector<32x1xf32> to vector<32x8xf32>
    %6 = arith.addf %3, %5 : vector<32x8xf32>
    %cst_5 = arith.constant 0.000000e+00 : f32
    %7 = vector.broadcast %cst_5 : f32 to vector<32x8xf32>
    %8 = arith.maximumf %6, %7 : vector<32x8xf32>
    %c0_6 = arith.constant 0 : index
    %c0_7 = arith.constant 0 : index
    %9 = vector.load %arg3[%c0_6, %c0_7] : memref<8x32xbf16, #tpu.memory_space<vmem>>, vector<8x32xbf16>
    %10 = arith.truncf %8 : vector<32x8xf32> to vector<32x8xbf16>
    %cst_8 = arith.constant dense<0.000000e+00> : vector<8x8xf32>
    %11 = tpu.matmul %9, %10, %cst_8 {dimension_numbers = #tpu.dot_dimension_numbers<[1], [0], [0], [1], [0, 0, 1, 1], [], []>} : vector<8x32xbf16>, vector<32x8xbf16>, vector<8x8xf32> -> vector<8x8xf32>
    %c0_9 = arith.constant 0 : index
    %c0_10 = arith.constant 0 : index
    %12 = vector.load %arg4[%c0_9, %c0_10] : memref<8x1xf32, #tpu.memory_space<vmem>>, vector<8x1xf32>
    %13 = vector.broadcast %12 : vector<8x1xf32> to vector<8x8xf32>
    %14 = arith.addf %11, %13 : vector<8x8xf32>
    %15 = math.tanh %14 : vector<8x8xf32>
    %cst_11 = arith.constant 2.000000e+00 : f32
    %16 = vector.broadcast %cst_11 : f32 to vector<8x8xf32>
    %17 = arith.mulf %15, %16 : vector<8x8xf32>
    %c0_12 = arith.constant 0 : index
    %c0_13 = arith.constant 0 : index
    %18 = vector.load %arg5[%c0_12, %c0_13] : memref<8x8xf32, #tpu.memory_space<vmem>>, vector<8x8xf32>
    tpu.vector_store %arg5[%c0_12, %c0_13], %17 {strides = array<i32>} : memref<8x8xf32, #tpu.memory_space<vmem>>, vector<8x8xf32>,
    return
  }
}

</mosaic_0001>

<bundles_post_ra>
// kernel: tpu_custom_call.1
= control target key start
LH: loop header
LB: loop body
LE: loop exit
PB: predicated region body
PF: predicated region fallthrough
CT: control target
= control target key end

     0   :  { %vm63_vm0 = vcmask 130048   ;;  %v253_v4 = vmov 0   ;;  %s331_s0 = inlined_call_operand.vmem [shape: f32[16,8], index: 0, kind: input, shape index: {}]   ;;  %s332_s1 = inlined_call_operand.vmem [shape: bf16[32,16], index: 1, kind: input, shape index: {}]   ;;  %s333_s2 = inlined_call_operand.vmem [shape: f32[32,1], index: 2, kind: input, shape index: {}]   ;;  %s334_s3 = inlined_call_operand.vmem [shape: bf16[8,32], index: 3, kind: input, shape index: {}]   ;;  %s335_s4 = inlined_call_operand.vmem [shape: f32[8,1], index: 4, kind: input, shape index: {}]   ;;  %s336_s5 = inlined_call_operand.hbm [shape: f32[8,8], index: 5, kind: output, shape index: {}]  }
   0x1   :  { %v22_v0 = vld [vmem:[%s331_s0] sm:$0xff]  ;;  %v23_v1 = vld [vmem:[%s331_s0 + $0x8] sm:$0xff]  ;;  %223 = vset.pattern.permute.xlu0 %v253_v4  ;;  %224 = vset.pattern.permute.xlu1 %v253_v4  ;;  %v31_v7 = vld [vmem:[%s333_s2 + $0x10] sm:$0xff] }
   0x2   :  { %v24_v2 = vpack.c.bf16 %v23_v1, %v22_v0  ;;  %v225_v3 = vld [vmem:[%s332_s1] sm:$0xff]   ;;  %v226_v6 = vld [vmem:[%s332_s1 + $0x8] sm:$0xff]  }
   0x3   :  { %v29_v5 = vld [vmem:[%s333_s2] sm:$0xff]  ;;  %207 = vmatprep.mubr.msk.bf16.mxu0 %vm63_vm0, %v225_v3 }
   0x4   :  { %205 = vmatprep.subr.bf16.mxu0 %v24_v2  ;;  %35 = vperm.xlu0 %223, %v29_v5  }
   0x5   :  { %206 = vmatpush3.bf16.msra.mxu0 %v24_v2 }
   0x6   :  { %10 = vsyncpa [#allocation3], 0  ;;  %v30_v8 = vld [vmem:[%s333_s2 + $0x8] sm:$0xff]  ;;  %45 = vperm.xlu1 %224, %v31_v7   ;;  %v32_v9 = vld [vmem:[%s333_s2 + $0x18] sm:$0xff]  ;;  %v254_v11 = vmov 0.0   ;;  %vm255_vm1 = vmmov 0  }
   0x7   :  { %v126_v10 = vld [vmem:[%s335_s4] sm:$0xff]  ;;  %211 = vmatprep.subr.bf16.mxu1 %v254_v11  ;;  %215 = vmatprep.mubr.msk.bf16.mxu1 %vm255_vm1, %v254_v11  ;;  %vm132_vm2 = vcmask 261120   ;;  %s256_s9 = smov [#allocation2]   ;;  %vm178_vm3 = vcmask 64512  }
   0x8   :  { %208 = vmatmul.mubr.msk.bf16.vlgmr.msra.gmra.mrb[0].mxu0 %vm63_vm0, %v226_v6  ;;  %40 = vperm.xlu0 %223, %v30_v8   ;;  %v123_v30 = vld [vmem:[%s334_s3] sm:$0xf]  ;;  %s186_s10 = sshll.u32 %s256_s9, 4  ;;  %s187_s10 = int_to_ptr.vmem [resolvable:$true] %s186_s10 }
   0x9   :  { %s229_s11 = scalar_lea.vmem %s187_s10, 128  ;;  %p234_p1 = scmp.lt.s32.totalorder %s187_s10, %s187_s10 }
   0xa   :  { %50 = vperm.xlu1 %224, %v32_v9   ;;  %p230_p0 = scmp.ne.s32.totalorder %s187_s10, %s229_s11  ;;  %p235_p2 = scmp.lt.s32.totalorder %s229_s11, %s229_s11 }
   0xc   :  { %129 = vperm.xlu0 %223, %v126_v10   ;;  %p236_p3 = por %p235_p2, %p234_p1 }
   0xe   :  { %p237_p4 = pnand %p236_p3, %p230_p0 }
  0x83   :  { %v36_v13 = vpop.permute.xlu0 %35 }
  0x85   :  { %v46_v12 = vpop.permute.xlu1 %45 }
  0x87   :  { %v41_v20 = vpop.permute.xlu0 %40 }
  0x89   :  { %v51_v15 = vpop.permute.xlu1 %50 }
  0x8b   :  { %v130_v31 = vpop.permute.xlu0 %129 }
  0xdb   :  { %v209_v14 = vpop.f32.mrb[0].mxu0 }
  0xdc   :  { %v113_v16 = vadd.f32 %v209_v14, %v46_v12  ;;  %v104_v17 = vpop.f32.mrb[1].mxu0 }
  0xdd   :  { %v105_v18 = vadd.f32 %v104_v17, %v36_v13  ;;  %v210_v19 = vpop.f32.mrb[2].mxu0 }
  0xde   :  { %v116_v21 = vadd.f32 %v210_v19, %v51_v15  ;;  %v107_v22 = vpop.f32.mrb[3].mxu0  ;;  %v121_v24 = vmax.f32 %v113_v16, 0.0 }
  0xdf   :  { %v108_v23 = vadd.f32 %v107_v22, %v41_v20  ;;  %v119_v26 = vmax.f32 %v105_v18, 0.0 }
  0xe0   :  { %v122_v25 = vmax.f32 %v116_v21, 0.0 }
  0xe1   :  { %v120_v27 = vmax.f32 %v108_v23, 0.0 }
  0xe2   :  { %v125_v28 = vpack.c.bf16 %v122_v25, %v121_v24 }
  0xe3   :  { %v124_v29 = vpack.c.bf16 %v120_v27, %v119_v26 }
  0xe5   :  { %212 = vmatpush3.bf16.msra.mxu1 %v124_v29 }
  0xe6   :  { %213 = vmatprep.subr.bf16.mxu1 %v254_v11 }
  0xe9   :  { %214 = vmatpush3.bf16.msra.mxu1 %v125_v28 }
  0xec   :  { %216 = vmatmul.mubr.msk.bf16.vlgmr.msra.gmra.mrb[0].mxu1 %vm132_vm2, %v123_v30 }
 0x1bf   :  { %v170_v32 = vpop.f32.mrb[0].mxu1 }
 0x1c0   :  { %v171_v33 = vadd.f32 %v170_v32, %v130_v31  ;;  %v217_v34 = vpop.f32.mrb[1].mxu1 }
 0x1c1   :  { %v173_v35 = vpop.f32.mrb[2].mxu1 }
 0x1c2   :  { %227 = vtanh.f32 %v171_v33  ;;  %v218_v36 = vpop.f32.mrb[3].mxu1 }
 0x1cc   :  { %v228_v37 = vpop.eup %227 }
 0x1cd   :  { %v177_v38 = vmul.f32 2.0, %v228_v37 }
 0x1cf   :  { %179 = vst.msk [vmem:[#allocation2] sm:$0xff] %vm178_vm3, %v177_v38 }
 0x1d0   :  { %240 = shalt.err (!%p237_p4)
}
 0x1d1   :  { %s241_s13 = scalar_lea.hbm %s336_s5, 128 }
 0x1d2   :  { %p242_p5 = scmp.ne.s32.totalorder %s336_s5, %s241_s13  ;;  %p245_p6 = scmp.lt.u32.totalorder %s241_s13, %s336_s5 }
 0x1d4   :  { %p247_p7 = pnand %p245_p6, %p242_p5 }
 0x1d6   :  { %250 = shalt.err (!%p247_p7)
}
 0x1d7   :  { %189 = dma.vmem_to_hbm [thread:$0]  %s187_s10, 128, %s336_s5, [#allocation3]  }
 0x1d8   :  { %251 = dma.done.wait [#allocation3], 128  }
 0x1d9   :  { %252 = vsyncadd [#allocation3], 4294967168 }
 0x1da   :  { %193 = vsyncpa [#allocation3], 1 }

</bundles_post_ra>
